<compile_context>
chip_gen: v7x
topology: tpu7x:2x2x1
jax: 0.10.0
libtpu: 0.0.40
codegen_flags: <defaults>
</compile_context>

<pallas_src>
from functools import partial

import jax
import jax.numpy as jnp
from jax import lax
from jax.experimental import pallas as pl
from jax.experimental.pallas import tpu as pltpu

C_IN = 640     # encoder_dim (hardcoded in the PyTorch module)
C_MID = 64     # cca_1x1 output channels
H = W = 5      # RENet feature-map spatial size (Linear(25, 5) in the module)
HW = H * W


class Args:
    num_class = 5
    way = 2
    shot = 1
    temperature = 0.2
    temperature_attn = 5.0
    self_method = "scr"


# --------------------------------------------------------------------------
# Support-side transform (hoisted out of the per-query-block kernel):
#   normalize_feature + 1x1 conv (bf16 MXU) + folded eval-BN + ReLU + L2 norm.
# --------------------------------------------------------------------------
def _spt_transform_kernel(spt_ref, w_ref, scale_ref, shift_ref, sn_ref, s64_ref):
    x = spt_ref[...]                                        # (way*HW, C_IN) f32
    mu = jnp.mean(x, axis=-1, keepdims=True)
    sn = x - mu                                             # normalize_feature
    y = jnp.dot(sn.astype(jnp.bfloat16), w_ref[...],
                preferred_element_type=jnp.float32)         # 1x1 conv == matmul
    y = jnp.maximum(y * scale_ref[...] + shift_ref[...], 0.0)   # folded BN + ReLU
    ss = jnp.sum(y * y, axis=-1, keepdims=True)
    # F.normalize(p=2, eps=1e-8): 1/max(||y||,1e-8) == rsqrt(max(||y||^2,1e-16))
    s64 = y * lax.rsqrt(jnp.maximum(ss, 1e-16))
    sn_ref[...] = sn
    s64_ref[...] = s64.astype(jnp.bfloat16)                 # correlation operand


# --------------------------------------------------------------------------
# Fused cca kernel (one grid step == one block of Q_BLK queries):
#   query transform + 4D correlation + gaussian_normalize + softmax attention
#   (both orientations) + attended pooling + cosine similarity / temperature.
# All tensors stay 2D; per-query / per-way group statistics are done with
# indicator matmuls (qgt for query groups over rows, gt for way groups over
# columns) so no tile-crossing reshapes are needed.
# --------------------------------------------------------------------------
def _cca_fused_kernel(qry_ref, sn_ref, s64_ref, gt_ref, qgt_ref, qgt_t_ref,
                      w_ref, scale_ref, shift_ref, out_ref, *,
                      hw, way, temperature, temperature_attn):
    f32 = jnp.float32
    ct = (((1,), (1,)), ((), ()))            # contract last dims: A @ B^T
    inv_t = 1.0 / temperature_attn
    inv_hw = 1.0 / hw
    inv_hw1 = 1.0 / (hw - 1)

    gt = gt_ref[...]                         # (way, way*HW) way-group indicator
    qgt = qgt_ref[...]                       # (QB, QB*HW)   query-group indicator
    qgt_t = qgt_t_ref[...]                   # (QB*HW, QB)   its transpose
    sn = sn_ref[...]                         # (way*HW, C_IN) f32  (precomputed)
    s64 = s64_ref[...]                       # (way*HW, C_MID) bf16 (precomputed)

    # ---- query-side feature transform (one big matmul for the whole block) ----
    x = qry_ref[...]                                         # (QB*HW, C_IN)
    mu = jnp.mean(x, axis=-1, keepdims=True)
    qn = x - mu                                              # normalize_feature
    y = jnp.dot(qn.astype(jnp.bfloat16), w_ref[...],
                preferred_element_type=f32)                  # 1x1 conv
    y = jnp.maximum(y * scale_ref[...] + shift_ref[...], 0.0)
    ss = jnp.sum(y * y, axis=-1, keepdims=True)
    q64 = y * lax.rsqrt(jnp.maximum(ss, 1e-16))              # L2 norm, eps=1e-8

    # ---- 4D correlation: corr[(q,kl),(n,ij)] = <q64[q,kl], s64[n,ij]> ----
    corr = lax.dot_general(q64.astype(jnp.bfloat16), s64, ct,
                           preferred_element_type=f32)       # (QB*HW, way*HW)
    corr2 = corr * corr

    # ==== attn_q path: gaussian_normalize + softmax over QUERY positions kl ====
    # Group stats over rows (per query) via qgt matmuls, folded into an affine.
    sum_q = jnp.dot(qgt, corr, preferred_element_type=f32)          # (QB, way*HW)
    sum_q2 = jnp.dot(qgt, corr2, preferred_element_type=f32)
    mean_q = sum_q * inv_hw
    var_q = (sum_q2 - sum_q * mean_q) * inv_hw1                     # unbiased
    scl_q = lax.rsqrt(var_q + 1e-5) * inv_t                         # EUP rsqrt
    off_q = -mean_q * scl_q
    scl_qb = jnp.dot(qgt_t, scl_q, preferred_element_type=f32)      # broadcast rows
    off_qb = jnp.dot(qgt_t, off_q, preferred_element_type=f32)
    # |argument| <= (HW-1)/sqrt(HW)/temperature_attn  -> no max subtraction needed
    eq = jnp.exp(corr * scl_qb + off_qb)
    den_q = jnp.dot(qgt, eq, preferred_element_type=f32)            # (QB, way*HW)
    inv_dq = pl.reciprocal(den_q, approx=True)                      # EUP recip
    p_q = eq * jnp.dot(qgt_t, inv_dq, preferred_element_type=f32)   # softmax over kl
    # attn_q summed over support positions ij -> (QB*HW, way)
    bq = lax.dot_general(p_q, gt, ct, preferred_element_type=f32)

    # ==== attn_s path: gaussian_normalize + softmax over SUPPORT positions ij ====
    sum_s = lax.dot_general(corr, gt, ct, preferred_element_type=f32)   # (QB*HW, way)
    sum_s2 = lax.dot_general(corr2, gt, ct, preferred_element_type=f32)
    mean_s = sum_s * inv_hw
    var_s = (sum_s2 - sum_s * mean_s) * inv_hw1
    scl_s = lax.rsqrt(var_s + 1e-5) * inv_t
    off_s = -mean_s * scl_s
    scl_sb = jnp.dot(scl_s, gt, preferred_element_type=f32)             # broadcast cols
    off_sb = jnp.dot(off_s, gt, preferred_element_type=f32)
    es = jnp.exp(corr * scl_sb + off_sb)
    den_s = lax.dot_general(es, gt, ct, preferred_element_type=f32)     # (QB*HW, way)
    inv_ds = pl.reciprocal(den_s, approx=True)
    p_s = es * jnp.dot(inv_ds, gt, preferred_element_type=f32)          # softmax over ij
    # attn_s summed over query positions kl -> (QB, way*HW)
    attn_s = jnp.dot(qgt, p_s, preferred_element_type=f32)

    # ==== attention-weighted pooling + cosine similarity / temperature ====
    # (match_net == identity, shot == 1)
    cols = []
    for n in range(way):                                    # way is a small constant
        # qry_pool[q,:] = (1/HW) sum_{kl in q} attn_q[q,n,kl] * qn[(q,kl),:]
        qp = jnp.dot(qgt, bq[:, n:n + 1] * qn,
                     preferred_element_type=f32) * inv_hw            # (QB, C_IN)
        # spt_pool[q,:] = (1/HW) sum_{ij in n} attn_s[q,(n,ij)] * sn[(n,ij),:]
        sp = jnp.dot(attn_s * gt[n:n + 1, :], sn,
                     preferred_element_type=f32) * inv_hw             # (QB, C_IN)
        num = jnp.sum(qp * sp, axis=-1, keepdims=True)
        den2 = (jnp.sum(qp * qp, axis=-1, keepdims=True) *
                jnp.sum(sp * sp, axis=-1, keepdims=True))
        # F.cosine_similarity eps=1e-8 on the product of norms
        cols.append(num * lax.rsqrt(jnp.maximum(den2, 1e-16)))
    out_ref[...] = jnp.concatenate(cols, axis=1) * (1.0 / temperature)


def cca_forward(spt_flat, qry_nlc, conv_w_bf16, bn_scale, bn_shift, args):
    way = spt_flat.shape[0] // HW
    num_qry = qry_nlc.shape[0]

    # ---- hoisted support transform: computed once, reused by every grid step ----
    sn, s64 = pl.pallas_call(
        _spt_transform_kernel,
        out_shape=(jax.ShapeDtypeStruct((way * HW, C_IN), jnp.float32),
                   jax.ShapeDtypeStruct((way * HW, C_MID), jnp.bfloat16)),
    )(spt_flat, conv_w_bf16, bn_scale, bn_shift)

    # ---- query blocking: one big step for small problems / single-TC chips,
    #      blocks of 16 (>=2 parallel steps, Q_BLK*HW % 8 == 0) for larger ones.
    if num_qry <= 16:
        qb = num_qry
    else:
        qb = 16
    pad = (-num_qry) % qb
    nq_pad = num_qry + pad
    qry_flat = qry_nlc.reshape(num_qry * HW, C_IN)
    if pad:
        qry_flat = jnp.pad(qry_flat, ((0, pad * HW), (0, 0)))

    # Indicator matrices: gt[n, m*HW+ij] = [m==n]; qgt[q, q'*HW+kl] = [q==q'].
    gt = jnp.repeat(jnp.eye(way, dtype=jnp.float32), HW, axis=1)
    qgt = jnp.repeat(jnp.eye(qb, dtype=jnp.float32), HW, axis=1)
    qgt_t = qgt.T

    kern = partial(_cca_fused_kernel, hw=HW, way=way,
                   temperature=args.temperature,
                   temperature_attn=args.temperature_attn)
    out = pl.pallas_call(
        kern,
        out_shape=jax.ShapeDtypeStruct((nq_pad, way), jnp.float32),
        grid=(nq_pad // qb,),
        in_specs=[pl.BlockSpec((qb * HW, C_IN), lambda i: (i, 0)),
                  pl.BlockSpec((way * HW, C_IN), lambda i: (0, 0)),
                  pl.BlockSpec((way * HW, C_MID), lambda i: (0, 0)),
                  pl.BlockSpec((way, way * HW), lambda i: (0, 0)),
                  pl.BlockSpec((qb, qb * HW), lambda i: (0, 0)),
                  pl.BlockSpec((qb * HW, qb), lambda i: (0, 0)),
                  pl.BlockSpec((C_IN, C_MID), lambda i: (0, 0)),
                  pl.BlockSpec((1, C_MID), lambda i: (0, 0)),
                  pl.BlockSpec((1, C_MID), lambda i: (0, 0))],
        out_specs=pl.BlockSpec((qb, way), lambda i: (i, 0)),
        compiler_params=pltpu.CompilerParams(
            dimension_semantics=("parallel",)),
    )(qry_flat, sn, s64, gt, qgt, qgt_t, conv_w_bf16, bn_scale, bn_shift)
    return out[:num_qry]


# --------------------------------------------------------------------------
# fc kernel: in-kernel spatial mean + Linear (no O(batch^2) indicator matmul).
# --------------------------------------------------------------------------
def _fc_kernel(x_ref, w_ref, b_ref, o_ref):
    xm = jnp.mean(x_ref[...], axis=1)                       # (bb, C_IN) spatial mean
    o_ref[...] = jnp.dot(xm, w_ref[...],
                         preferred_element_type=jnp.float32) + b_ref[...]


def fc_forward_call(x_nlc, fc_w, fc_b):
    batch, hw, cin = x_nlc.shape
    ncls = fc_w.shape[1]
    bb = batch if batch <= 64 else 64
    pad = (-batch) % bb
    if pad:
        x_nlc = jnp.pad(x_nlc, ((0, pad), (0, 0), (0, 0)))
    pb = batch + pad
    out = pl.pallas_call(
        _fc_kernel,
        out_shape=jax.ShapeDtypeStruct((pb, ncls), jnp.float32),
        grid=(pb // bb,),
        in_specs=[pl.BlockSpec((bb, hw, cin), lambda i: (i, 0, 0)),
                  pl.BlockSpec((cin, ncls), lambda i: (0, 0)),
                  pl.BlockSpec((1, ncls), lambda i: (0, 0))],
        out_specs=pl.BlockSpec((bb, ncls), lambda i: (i, 0)),
        compiler_params=pltpu.CompilerParams(
            dimension_semantics=("parallel",)),
    )(x_nlc, fc_w, fc_b)
    return out[:batch]


# --------------------------------------------------------------------------
# Plain-JAX glue (layout conversion + parameter setup)
# --------------------------------------------------------------------------
def nchw_to_nlc(x):
    n, c, h, w = x.shape
    return jnp.transpose(x.reshape(n, c, h * w), (0, 2, 1))


class RENetPallas:
    def __init__(self, args, mode=None):
        self.args = args
        self.mode = mode
        key = jax.random.PRNGKey(0)
        k = jax.random.split(key, 8)
        # cca_1x1: Conv2d(640, 64, 1, bias=False) + BatchNorm2d(64) + ReLU
        self.conv_w = 0.05 * jax.random.normal(k[0], (C_IN, C_MID), jnp.float32)
        self.conv_w_bf16 = self.conv_w.astype(jnp.bfloat16)     # MXU operand
        gamma = 1.0 + 0.1 * jax.random.normal(k[1], (C_MID,), jnp.float32)
        beta = 0.1 * jax.random.normal(k[2], (C_MID,), jnp.float32)
        run_mean = 0.1 * jax.random.normal(k[3], (C_MID,), jnp.float32)
        run_var = jax.random.uniform(k[4], (C_MID,), jnp.float32, 0.5, 1.5)
        eps = 1e-5
        scale = gamma / jnp.sqrt(run_var + eps)
        shift = beta - run_mean * scale
        self.bn_scale = scale.reshape(1, C_MID)
        self.bn_shift = shift.reshape(1, C_MID)
        # fc: Linear(640, num_class)
        self.fc_w = 0.02 * jax.random.normal(k[5], (C_IN, args.num_class), jnp.float32)
        self.fc_b = 0.02 * jax.random.normal(k[6], (1, args.num_class), jnp.float32)
        # TODO(synk): ResNet / scr_module / match_net* / CCA / self.lin params
        # not created (their definitions are not part of the provided source).

    def __call__(self, inputs):
        if self.mode == "fc":
            return self.fc_forward(inputs)
        elif self.mode == "cca":
            spt, qry = inputs
            return self.cca(spt, qry)
        else:
            raise ValueError("Unknown mode")

    def fc_forward(self, x):
        x_nlc = nchw_to_nlc(x)                          # (batch, HW, C_IN)
        return fc_forward_call(x_nlc, self.fc_w, self.fc_b)

    def cca(self, spt, qry):
        spt = spt[0]                                    # squeeze(0): (way, C, H, W)
        way = spt.shape[0]
        spt_flat = nchw_to_nlc(spt).reshape(way * HW, C_IN)
        qry_nlc = nchw_to_nlc(qry)                      # (num_qry, HW, C_IN)
        sim = cca_forward(spt_flat, qry_nlc, self.conv_w_bf16,
                          self.bn_scale, self.bn_shift, self.args)
        return sim   # eval-mode output: similarity_matrix / temperature, (num_qry, way)


if __name__ == "__main__":
    args = Args()
    num_qry = 2
    key = jax.random.PRNGKey(0)
    k1, k2 = jax.random.split(key, 2)
    spt = jax.random.normal(k1, (1, args.way, C_IN, H, W), jnp.float32)
    qry = jax.random.normal(k2, (num_qry, C_IN, H, W), jnp.float32)

    model_cca = RENetPallas(args, mode="cca")
    sim = model_cca((spt, qry))
    jax.block_until_ready(sim)
    assert sim.shape == (num_qry, args.way)
    assert bool(jnp.all(jnp.isfinite(sim)))

    model_fc = RENetPallas(args, mode="fc")
    logits = model_fc(qry)
    jax.block_until_ready(logits)
    assert logits.shape == (num_qry, args.num_class)
    assert bool(jnp.all(jnp.isfinite(logits)))

    print("KERNEL_OK")
</pallas_src>

<mosaic_0001>
module attributes {stable_mosaic.version = 11 : i64} {
  func.func @_spt_transform_kernel(%arg0: memref<50x640xf32, #tpu.memory_space<vmem>>, %arg1: memref<640x64xbf16, #tpu.memory_space<vmem>>, %arg2: memref<1x64xf32, #tpu.memory_space<vmem>>, %arg3: memref<1x64xf32, #tpu.memory_space<vmem>>, %arg4: memref<50x640xf32, #tpu.memory_space<vmem>>, %arg5: memref<50x64xbf16, #tpu.memory_space<vmem>>) attributes {dimension_semantics = [], scalar_prefetch = 0 : i64, scratch_operands = 0 : i64, tpu.core_type = #tpu.core_type<tc>} {
    %c0 = arith.constant 0 : index
    %c0_0 = arith.constant 0 : index
    %0 = vector.load %arg0[%c0, %c0_0] : memref<50x640xf32, #tpu.memory_space<vmem>>, vector<50x640xf32>
    %cst = arith.constant dense<0.000000e+00> : vector<50xf32>
    %1 = vector.multi_reduction <add>, %0, %cst [1] : vector<50x640xf32> to vector<50xf32>
    %2 = vector.shape_cast %1 : vector<50xf32> to vector<50x1xf32>
    %cst_1 = arith.constant 6.400000e+02 : f32
    %3 = vector.broadcast %cst_1 : f32 to vector<50x1xf32>
    %4 = arith.divf %2, %3 : vector<50x1xf32>
    %5 = vector.broadcast %4 : vector<50x1xf32> to vector<50x640xf32>
    %6 = arith.subf %0, %5 : vector<50x640xf32>
    %7 = arith.truncf %6 : vector<50x640xf32> to vector<50x640xbf16>
    %c0_2 = arith.constant 0 : index
    %c0_3 = arith.constant 0 : index
    %8 = vector.load %arg1[%c0_2, %c0_3] : memref<640x64xbf16, #tpu.memory_space<vmem>>, vector<640x64xbf16>
    %cst_4 = arith.constant dense<0.000000e+00> : vector<50x64xf32>
    %9 = tpu.matmul %7, %8, %cst_4 {dimension_numbers = #tpu.dot_dimension_numbers<[1], [0], [0], [1], [0, 0, 1, 1], [], []>} : vector<50x640xbf16>, vector<640x64xbf16>, vector<50x64xf32> -> vector<50x64xf32>
    %c0_5 = arith.constant 0 : index
    %c0_6 = arith.constant 0 : index
    %10 = vector.load %arg2[%c0_5, %c0_6] : memref<1x64xf32, #tpu.memory_space<vmem>>, vector<1x64xf32>
    %11 = vector.broadcast %10 : vector<1x64xf32> to vector<50x64xf32>
    %12 = arith.mulf %9, %11 : vector<50x64xf32>
    %c0_7 = arith.constant 0 : index
    %c0_8 = arith.constant 0 : index
    %13 = vector.load %arg3[%c0_7, %c0_8] : memref<1x64xf32, #tpu.memory_space<vmem>>, vector<1x64xf32>
    %14 = vector.broadcast %13 : vector<1x64xf32> to vector<50x64xf32>
    %15 = arith.addf %12, %14 : vector<50x64xf32>
    %cst_9 = arith.constant 0.000000e+00 : f32
    %16 = vector.broadcast %cst_9 : f32 to vector<50x64xf32>
    %17 = arith.maximumf %15, %16 : vector<50x64xf32>
    %18 = arith.mulf %17, %17 : vector<50x64xf32>
    %cst_10 = arith.constant dense<0.000000e+00> : vector<50xf32>
    %19 = vector.multi_reduction <add>, %18, %cst_10 [1] : vector<50x64xf32> to vector<50xf32>
    %20 = vector.shape_cast %19 : vector<50xf32> to vector<50x1xf32>
    %cst_11 = arith.constant 1.000000e-16 : f32
    %21 = vector.broadcast %cst_11 : f32 to vector<50x1xf32>
    %22 = arith.maximumf %20, %21 : vector<50x1xf32>
    %23 = math.rsqrt %22 : vector<50x1xf32>
    %24 = vector.broadcast %23 : vector<50x1xf32> to vector<50x64xf32>
    %25 = arith.mulf %17, %24 : vector<50x64xf32>
    %c0_12 = arith.constant 0 : index
    %c0_13 = arith.constant 0 : index
    %26 = vector.load %arg4[%c0_12, %c0_13] : memref<50x640xf32, #tpu.memory_space<vmem>>, vector<50x640xf32>
    tpu.vector_store %arg4[%c0_12, %c0_13], %6 {strides = array<i32>} : memref<50x640xf32, #tpu.memory_space<vmem>>, vector<50x640xf32>,
    %27 = arith.truncf %25 : vector<50x64xf32> to vector<50x64xbf16>
    %c0_14 = arith.constant 0 : index
    %c0_15 = arith.constant 0 : index
    %28 = vector.load %arg5[%c0_14, %c0_15] : memref<50x64xbf16, #tpu.memory_space<vmem>>, vector<50x64xbf16>
    tpu.vector_store %arg5[%c0_14, %c0_15], %27 {strides = array<i32>} : memref<50x64xbf16, #tpu.memory_space<vmem>>, vector<50x64xbf16>,
    return
  }
}

</mosaic_0001>

<bundles_post_ra>
// kernel: tpu_custom_call.1
= control target key start
LH: loop header
LB: loop body
LE: loop exit
PB: predicated region body
PF: predicated region fallthrough
CT: control target
= control target key end

     0   :  { %11 = vsyncpa [#allocation3], 0  ;;  %vm93_vm0 = vcmask 1041408   ;;  %s1685_s0 = inlined_call_operand.vmem [shape: f32[50,640], index: 0, kind: input, shape index: {}]   ;;  %s1686_s1 = inlined_call_operand.vmem [shape: bf16[640,64], index: 1, kind: input, shape index: {}]   ;;  %s1687_s2 = inlined_call_operand.vmem [shape: f32[1,64], index: 2, kind: input, shape index: {}]   ;;  %s1688_s3 = inlined_call_operand.vmem [shape: f32[1,64], index: 3, kind: input, shape index: {}]   ;;  %s1689_s4 = inlined_call_operand.hbm [shape: f32[50,640], index: 4, kind: output, shape index: {0}]   ;;  %s1690_s5 = inlined_call_operand.hbm [shape: bf16[50,64], index: 5, kind: output, shape index: {1}]  }
   0x1   :  { %v1206_v0 = vld [vmem:[%s1685_s0] sm:$0xff]  ;;  %v1211_v1 = vld [vmem:[%s1685_s0 + $0x8] sm:$0xff]  ;;  %v1216_v2 = vld [vmem:[%s1685_s0 + $0x10] sm:$0xff] }
   0x2   :  { %v57_v3 = vadd.f32 %v1211_v1, %v1206_v0  ;;  %v1223_v4 = vld [vmem:[%s1685_s0 + $0x50] sm:$0xff]  ;;  %v1228_v5 = vld [vmem:[%s1685_s0 + $0x18] sm:$0xff]  ;;  %v1238_v7 = vld [vmem:[%s1685_s0 + $0x60] sm:$0xff] }
   0x3   :  { %v1233_v6 = vld [vmem:[%s1685_s0 + $0x58] sm:$0xff]  ;;  %v1243_v8 = vld [vmem:[%s1685_s0 + $0x20] sm:$0xff]  ;;  %v1251_v11 = vld [vmem:[%s1685_s0 + $0x28] sm:$0xff] }
   0x4   :  { %v58_v9 = vadd.f32 %v57_v3, %v1216_v2  ;;  %v69_v10 = vadd.f32 %v1233_v6, %v1223_v4  ;;  %v1256_v12 = vld [vmem:[%s1685_s0 + $0x30] sm:$0xff]  ;;  %v1261_v13 = vld [vmem:[%s1685_s0 + $0x68] sm:$0xff]  ;;  %v1266_v14 = vld [vmem:[%s1685_s0 + $0x38] sm:$0xff] }
   0x5   :  { %v1271_v15 = vld [vmem:[%s1685_s0 + $0x40] sm:$0xff]  ;;  %v63_v16 = vadd.f32 %v1256_v12, %v1251_v11  ;;  %v1280_v19 = vld [vmem:[%s1685_s0 + $0x78] sm:$0xff]  ;;  %v1290_v21 = vld [vmem:[%s1685_s0 + $0x88] sm:$0xff] }
   0x6   :  { %v59_v17 = vadd.f32 %v58_v9, %v1228_v5  ;;  %v70_v18 = vadd.f32 %v69_v10, %v1238_v7  ;;  %v1285_v20 = vld [vmem:[%s1685_s0 + $0x80] sm:$0xff]  ;;  %v1295_v22 = vld [vmem:[%s1685_s0 + $0x70] sm:$0xff]  ;;  %v1300_v23 = vld [vmem:[%s1685_s0 + $0x48] sm:$0xff] }
   0x7   :  { %v64_v24 = vadd.f32 %v63_v16, %v1266_v14  ;;  %v75_v25 = vadd.f32 %v1285_v20, %v1280_v19  ;;  %v1308_v26 = vld [vmem:[%s1685_s0 + $0xc8] sm:$0xff]  ;;  %v1315_v29 = vld [vmem:[%s1685_s0 + $0x90] sm:$0xff]  ;;  %v1325_v31 = vld [vmem:[%s1685_s0 + $0xd8] sm:$0xff] }
   0x8   :  { %v60_v27 = vadd.f32 %v59_v17, %v1243_v8  ;;  %v71_v28 = vadd.f32 %v70_v18, %v1261_v13  ;;  %v1320_v30 = vld [vmem:[%s1685_s0 + $0xd0] sm:$0xff]  ;;  %v1331_v33 = vld [vmem:[%s1685_s0 + $0x98] sm:$0xff]  ;;  %v1339_v36 = vld [vmem:[%s1685_s0 + $0xa0] sm:$0xff] }
   0x9   :  { %v65_v32 = vadd.f32 %v64_v24, %v1271_v15  ;;  %v76_v34 = vadd.f32 %v75_v25, %v1290_v21  ;;  %v87_v35 = vadd.f32 %v1320_v30, %v1308_v26  ;;  %v1344_v37 = vld [vmem:[%s1685_s0 + $0xa8] sm:$0xff]  ;;  %v1350_v39 = vld [vmem:[%s1685_s0 + $0xe0] sm:$0xff]  ;;  %v1355_v40 = vld [vmem:[%s1685_s0 + $0xb0] sm:$0xff] }
   0xa   :  { %61 = vadd.xlane.f32.xlu0 %v60_v27  ;;  %v72_v38 = vadd.f32 %v71_v28, %v1295_v22  ;;  %v1360_v41 = vld [vmem:[%s1685_s0 + $0xb8] sm:$0xff]  ;;  %v81_v42 = vadd.f32 %v1344_v37, %v1339_v36  ;;  %v1369_v45 = vld [vmem:[%s1685_s0 + $0xe8] sm:$0xff]  ;;  %v1375_v47 = vld [vmem:[%s1685_s0 + $0xc0] sm:$0xff] }
   0xb   :  { %v66_v43 = vadd.f32 %v65_v32, %v1300_v23  ;;  %v77_v44 = vadd.f32 %v76_v34, %v1315_v29  ;;  %v88_v46 = vadd.f32 %v87_v35, %v1325_v31  ;;  %v1380_v48 = vld [vmem:[%s1685_s0 + $0xf0] sm:$0x3]  ;;  %v1385_v49 = vld [vmem:[%s1685_s0 + $0xf8] sm:$0x3]  ;;  %v1390_v50 = vld [vmem:[%s1685_s0 + $0x100] sm:$0x3] }
   0xc   :  { %73 = vadd.xlane.f32.xlu1 %v72_v38  ;;  %v82_v51 = vadd.f32 %v81_v42, %v1355_v40  ;;  %v1396_v52 = vld [vmem:[%s1685_s0 + $0x108] sm:$0x3]  ;;  %v1401_v53 = vld [vmem:[%s1685_s0 + $0x110] sm:$0x3]  ;;  %v94_v54 = vsel %vm93_vm0, %v1380_v48, 0.0  ;;  %v95_v55 = vsel %vm93_vm0, %v1385_v49, 0.0 }
   0xd   :  { %v78_v56 = vadd.f32 %v77_v44, %v1331_v33  ;;  %v89_v57 = vadd.f32 %v88_v46, %v1350_v39  ;;  %v96_v58 = vadd.f32 %v95_v55, %v94_v54  ;;  %v97_v59 = vsel %vm93_vm0, %v1390_v50, 0.0  ;;  %v1065_v60 = vld [vmem:[%s1686_s1 + $0x40] sm:$0xff]   ;;  %v1069_v25 = vld [vmem:[%s1686_s1 + $0x48] sm:$0xff]   ;;  %v1073_v35 = vld [vmem:[%s1686_s1 + $0x50] sm:$0xff]  }
   0xe   :  { %67 = vadd.xlane.f32.xlu0 %v66_v43  ;;  %v83_v61 = vadd.f32 %v82_v51, %v1360_v41  ;;  %v99_v62 = vsel %vm93_vm0, %v1396_v52, 0.0  ;;  %927 = vmatprep.subr.bf16.mxu0 %v1065_v60  ;;  %v1066_v3 = vld [vmem:[%s1686_s1] sm:$0xff]   ;;  %v101_v16 = vsel %vm93_vm0, %v1401_v53, 0.0  ;;  %v1070_v28 = vld [vmem:[%s1686_s1 + $0x8] sm:$0xff]   ;;  %v1074_v38 = vld [vmem:[%s1686_s1 + $0x10] sm:$0xff]  }
   0xf   :  { %v98_v63 = vadd.f32 %v97_v59, %v96_v58  ;;  %v90_v9 = vadd.f32 %v89_v57, %v1369_v45  ;;  %v1067_v17 = vld [vmem:[%s1686_s1 + $0xc0] sm:$0xff]   ;;  %928 = vmatpush3.bf16.msra.mxu0 %v1066_v3  ;;  %v1071_v32 = vld [vmem:[%s1686_s1 + $0xc8] sm:$0xff]   ;;  %v1075_v42 = vld [vmem:[%s1686_s1 + $0xd0] sm:$0xff]  }
  0x10   :  { %79 = vadd.xlane.f32.xlu1 %v78_v56  ;;  %v84_v10 = vadd.f32 %v83_v61, %v1375_v47  ;;  %v1068_v24 = vld [vmem:[%s1686_s1 + $0x80] sm:$0xff]   ;;  %967 = vmatprep.subr.bf16.mxu1 %v1067_v17  ;;  %v1072_v34 = vld [vmem:[%s1686_s1 + $0x88] sm:$0xff]   ;;  %v1076_v43 = vld [vmem:[%s1686_s1 + $0x90] sm:$0xff]  }
  0x11   :  { %v100_v18 = vadd.f32 %v99_v62, %v98_v63  ;;  %968 = vmatpush3.bf16.msra.mxu1 %v1068_v24  ;;  %929 = vmatprep.subr.bf16.mxu0 %v1069_v25  ;;  %v1077_v44 = vld [vmem:[%s1686_s1 + $0x58] sm:$0xff]   ;;  %v1081_v55 = vld [vmem:[%s1686_s1 + $0x60] sm:$0xff]   ;;  %v1085_v59 = vld [vmem:[%s1686_s1 + $0x68] sm:$0xff]  }
  0x12   :  { %85 = vadd.xlane.f32.xlu0 %v84_v10  ;;  %969 = vmatprep.subr.bf16.mxu1 %v1071_v32  ;;  %v1078_v46 = vld [vmem:[%s1686_s1 + $0x18] sm:$0xff]   ;;  %v1082_v56 = vld [vmem:[%s1686_s1 + $0x20] sm:$0xff]   ;;  %v1086_v60 = vld [vmem:[%s1686_s1 + $0x28] sm:$0xff]  }
  0x13   :  { %v102_v27 = vadd.f32 %v101_v16, %v100_v18  ;;  %930 = vmatpush3.bf16.msra.mxu0 %v1070_v28  ;;  %v1079_v51 = vld [vmem:[%s1686_s1 + $0xd8] sm:$0xff]   ;;  %v1083_v57 = vld [vmem:[%s1686_s1 + $0xe0] sm:$0xff]   ;;  %v1087_v61 = vld [vmem:[%s1686_s1 + $0xe8] sm:$0xff]  }
  0x14   :  { %91 = vadd.xlane.f32.xlu1 %v90_v9  ;;  %931 = vmatprep.subr.bf16.mxu0 %v1073_v35  ;;  %v1080_v54 = vld [vmem:[%s1686_s1 + $0x98] sm:$0xff]   ;;  %v1084_v58 = vld [vmem:[%s1686_s1 + $0xa0] sm:$0xff]   ;;  %v1088_v62 = vld [vmem:[%s1686_s1 + $0xa8] sm:$0xff]  }
  0x15   :  { %970 = vmatpush3.bf16.msra.mxu1 %v1072_v34  ;;  %v1089_v63 = vld [vmem:[%s1686_s1 + $0x70] sm:$0xff]   ;;  %v1093_v16 = vld [vmem:[%s1686_s1 + $0x78] sm:$0xff]   ;;  %v1517_v25 = vld [vmem:[%s1686_s1 + $0x100] sm:$0xff]  }
  0x16   :  { %103 = vadd.xlane.f32.xlu0 %v102_v27  ;;  %971 = vmatprep.subr.bf16.mxu1 %v1075_v42  ;;  %v1090_v3 = vld [vmem:[%s1686_s1 + $0x30] sm:$0xff]   ;;  %v1094_v17 = vld [vmem:[%s1686_s1 + $0x38] sm:$0xff]  }
  0x17   :  { %932 = vmatpush3.bf16.msra.mxu0 %v1074_v38  ;;  %v1091_v9 = vld [vmem:[%s1686_s1 + $0xf0] sm:$0xff]   ;;  %v1095_v18 = vld [vmem:[%s1686_s1 + $0xf8] sm:$0xff]  }
  0x18   :  { %933 = vmatprep.subr.bf16.mxu0 %v1077_v44  ;;  %v1092_v10 = vld [vmem:[%s1686_s1 + $0xb0] sm:$0xff]   ;;  %v1096_v24 = vld [vmem:[%s1686_s1 + $0xb8] sm:$0xff]  }
  0x19   :  { %972 = vmatpush3.bf16.msra.mxu1 %v1076_v43 }
  0x1a   :  { %973 = vmatprep.subr.bf16.mxu1 %v1079_v51 }
  0x1b   :  { %934 = vmatpush3.bf16.msra.mxu0 %v1078_v46 }
  0x1c   :  { %935 = vmatprep.subr.bf16.mxu0 %v1081_v55 }
  0x1d   :  { %974 = vmatpush3.bf16.msra.mxu1 %v1080_v54 }
  0x1e   :  { %975 = vmatprep.subr.bf16.mxu1 %v1083_v57 }
  0x1f   :  { %936 = vmatpush3.bf16.msra.mxu0 %v1082_v56 }
  0x20   :  { %937 = vmatprep.subr.bf16.mxu0 %v1085_v59 }
  0x21   :  { %976 = vmatpush3.bf16.msra.mxu1 %v1084_v58 }
  0x22   :  { %977 = vmatprep.subr.bf16.mxu1 %v1087_v61 }
  0x23   :  { %938 = vmatpush3.bf16.msra.mxu0 %v1086_v60 }
  0x24   :  { %939 = vmatprep.subr.bf16.mxu0 %v1089_v63 }
  0x25   :  { %978 = vmatpush3.bf16.msra.mxu1 %v1088_v62 }
  0x26   :  { %979 = vmatprep.subr.bf16.mxu1 %v1091_v9 }
  0x27   :  { %940 = vmatpush3.bf16.msra.mxu0 %v1090_v3 }
  0x28   :  { %941 = vmatprep.subr.bf16.mxu0 %v1093_v16 }
  0x29   :  { %980 = vmatpush3.bf16.msra.mxu1 %v1092_v10 }
  0x2a   :  { %981 = vmatprep.subr.bf16.mxu1 %v1095_v18 }
  0x2b   :  { %942 = vmatpush3.bf16.msra.mxu0 %v1094_v17 }
  0x2c   :  { %1019 = vmatprep.subr.bf16.mxu0 %v1517_v25 }
  0x2d   :  { %982 = vmatpush3.bf16.msra.mxu1 %v1096_v24 }
  0x2e   :  { %1043 = vmatprep.subr.bf16.mxu1 %v1517_v25 }
  0x2f   :  { %12 = vsyncpa [#allocation5], 0  ;;  %vm722_vm1 = vcmask 523264   ;;  %vm741_vm2 = vcmask 517120  }
  0x97   :  { %v62_v27 = vpop.xlane.xlu0 %61 }
  0x98   :  { %v106_v28 = vmul.f32 0.0015625, %v62_v27 }
  0x99   :  { %v74_v32 = vpop.xlane.xlu1 %73 }
  0x9a   :  { %v108_v34 = vmul.f32 0.0015625, %v74_v32  ;;  %v114_v35 = vsub.f32 %v1211_v1, %v106_v28  ;;  %v116_v38 = vsub.f32 %v1228_v5, %v106_v28  ;;  %v113_v42 = vsub.f32 %v1206_v0, %v106_v28 }
  0x9b   :  { %v68_v43 = vpop.xlane.xlu0 %67  ;;  %v115_v44 = vsub.f32 %v1216_v2, %v106_v28  ;;  %v1526_v46 = vsub.f32 %v1243_v8, %v106_v28 }
  0x9c   :  { %v1529_v51 = vsub.f32 %v1295_v22, %v108_v34  ;;  %v107_v54 = vmul.f32 0.0015625, %v68_v43  ;;  %767 = vst [vmem:[#allocation2 + $0x8] sm:$0xff] %v114_v35  ;;  %769 = vst [vmem:[#allocation2 + $0x18] sm:$0xff] %v116_v38  ;;  %v124_v55 = vsub.f32 %v1233_v6, %v108_v34  ;;  %v126_v1 = vsub.f32 %v1261_v13, %v108_v34  ;;  %v1104_v43 = vld [vmem:[%s1686_s1 + $0x138] sm:$0xff]  }
  0x9d   :  { %766 = vst [vmem:[#allocation2] sm:$0xff] %v113_v42  ;;  %v80_v5 = vpop.xlane.xlu1 %79  ;;  %768 = vst [vmem:[#allocation2 + $0x10] sm:$0xff] %v115_v44  ;;  %v1534_v0 = vsub.f32 %v1223_v4, %v108_v34  ;;  %v1537_v2 = vsub.f32 %v1238_v7, %v108_v34 }
  0x9e   :  { %770 = vst [vmem:[#allocation2 + $0x20] sm:$0xff] %v1526_v46  ;;  %780 = vst [vmem:[#allocation2 + $0x70] sm:$0xff] %v1529_v51  ;;  %v109_v8 = vmul.f32 0.0015625, %v80_v5  ;;  %v119_v22 = vsub.f32 %v1256_v12, %v107_v54  ;;  %v121_v56 = vsub.f32 %v1271_v15, %v107_v54  ;;  %v118_v6 = vsub.f32 %v1251_v11, %v107_v54 }
  0x9f   :  { %777 = vst [vmem:[#allocation2 + $0x58] sm:$0xff] %v124_v55  ;;  %779 = vst [vmem:[#allocation2 + $0x68] sm:$0xff] %v126_v1  ;;  %v120_v13 = vsub.f32 %v1266_v14, %v107_v54  ;;  %v86_v4 = vpop.xlane.xlu0 %85  ;;  %v1548_v7 = vsub.f32 %v1300_v23, %v107_v54  ;;  %v1098_v23 = vld [vmem:[%s1686_s1 + $0x108] sm:$0xff]  }
  0xa0   :  { %776 = vst [vmem:[#allocation2 + $0x50] sm:$0xff] %v1534_v0  ;;  %778 = vst [vmem:[#allocation2 + $0x60] sm:$0xff] %v1537_v2  ;;  %v1551_v57 = vsub.f32 %v1331_v33, %v109_v8  ;;  %v149_v12 = vpack.c.bf16 %v119_v22, %v114_v35  ;;  %v151_v15 = vpack.c.bf16 %v121_v56, %v116_v38  ;;  %v110_v63 = vmul.f32 0.0015625, %v86_v4  ;;  %v1103_v35 = vld [vmem:[%s1686_s1 + $0x130] sm:$0xff]  }
  0xa1   :  { %772 = vst [vmem:[#allocation2 + $0x30] sm:$0xff] %v119_v22  ;;  %774 = vst [vmem:[#allocation2 + $0x40] sm:$0xff] %v121_v56  ;;  %v148_v11 = vpack.c.bf16 %v118_v6, %v113_v42  ;;  %v150_v58 = vpack.c.bf16 %v120_v13, %v115_v44  ;;  %v129_v14 = vsub.f32 %v1285_v20, %v109_v8  ;;  %v92_v60 = vpop.xlane.xlu1 %91 }
  0xa2   :  { %771 = vst [vmem:[#allocation2 + $0x28] sm:$0xff] %v118_v6  ;;  %773 = vst [vmem:[#allocation2 + $0x38] sm:$0xff] %v120_v13  ;;  %v131_v59 = vsub.f32 %v1315_v29, %v109_v8  ;;  %v128_v61 = vsub.f32 %v1280_v19, %v109_v8  ;;  %520 = vmatprep.mubr.bf16.mxu0 %v149_v12  ;;  %584 = vmatprep.mubr.bf16.mxu1 %v151_v15  ;;  %v111_v33 = vmul.f32 0.0015625, %v92_v60 }
  0xa3   :  { %775 = vst [vmem:[#allocation2 + $0x48] sm:$0xff] %v1548_v7  ;;  %785 = vst [vmem:[#allocation2 + $0x98] sm:$0xff] %v1551_v57  ;;  %v130_v62 = vsub.f32 %v1290_v21, %v109_v8  ;;  %521 = vmatmul.mubr.bf16.vlgmr.msra.gmra.mrb[0].mxu0 %v148_v11  ;;  %585 = vmatmul.mubr.bf16.vlgmr.msra.gmra.mrb[0].mxu1 %v150_v58  ;;  %v154_v20 = vpack.c.bf16 %v129_v14, %v124_v55  ;;  %v104_v19 = vpop.xlane.xlu0 %103  ;;  %v1099_v21 = vld [vmem:[%s1686_s1 + $0x110] sm:$0xff]  }
  0xa4   :  { %782 = vst [vmem:[#allocation2 + $0x80] sm:$0xff] %v129_v14  ;;  %v156_v29 = vpack.c.bf16 %v131_v59, %v126_v1  ;;  %784 = vst [vmem:[#allocation2 + $0x90] sm:$0xff] %v131_v59  ;;  %1020 = vmatpush3.bf16.msra.mxu0 %v1517_v25  ;;  %1051 = vmatpush3.bf16.msra.mxu1 %v1517_v25  ;;  %v134_v3 = vsub.f32 %v1344_v37, %v110_v63  ;;  %v112_v10 = vmul.f32 0.0015625, %v104_v19 }
  0xa5   :  { %781 = vst [vmem:[#allocation2 + $0x78] sm:$0xff] %v128_v61  ;;  %783 = vst [vmem:[#allocation2 + $0x88] sm:$0xff] %v130_v62  ;;  %v139_v9 = vsub.f32 %v1320_v30, %v111_v33  ;;  %528 = vmatprep.mubr.bf16.mxu0 %v154_v20  ;;  %v136_v16 = vsub.f32 %v1360_v41, %v110_v63  ;;  %v141_v17 = vsub.f32 %v1350_v39, %v111_v33 }
  0xa6   :  { %592 = vmatprep.mubr.bf16.mxu1 %v156_v29  ;;  %v133_v18 = vsub.f32 %v1339_v36, %v110_v63  ;;  %1021 = vmatprep.subr.bf16.mxu0 %v1098_v23  ;;  %787 = vst [vmem:[#allocation2 + $0xa8] sm:$0xff] %v134_v3  ;;  %v138_v37 = vsub.f32 %v1308_v26, %v111_v33 }
  0xa7   :  { %1044 = vmatprep.subr.bf16.mxu1 %v1098_v23  ;;  %792 = vst [vmem:[#allocation2 + $0xd0] sm:$0xff] %v139_v9  ;;  %v135_v30 = vsub.f32 %v1355_v40, %v110_v63  ;;  %789 = vst [vmem:[#allocation2 + $0xb8] sm:$0xff] %v136_v16  ;;  %v140_v24 = vsub.f32 %v1325_v31, %v111_v33  ;;  %v1576_v25 = vsub.f32 %v1401_v53, %v112_v10  ;;  %v1100_v31 = vld [vmem:[%s1686_s1 + $0x118] sm:$0xff]  }
  0xa8   :  { %794 = vst [vmem:[#allocation2 + $0xe0] sm:$0xff] %v141_v17  ;;  %786 = vst [vmem:[#allocation2 + $0xa0] sm:$0xff] %v133_v18  ;;  %v144_v39 = vsub.f32 %v1385_v49, %v112_v10  ;;  %1022 = vmatpush3.bf16.msra.mxu0 %v1098_v23  ;;  %1052 = vmatpush3.bf16.msra.mxu1 %v1098_v23  ;;  %v146_v36 = vsub.f32 %v1396_v52, %v112_v10 }
  0xa9   :  { %791 = vst [vmem:[#allocation2 + $0xc8] sm:$0xff] %v138_v37  ;;  %788 = vst [vmem:[#allocation2 + $0xb0] sm:$0xff] %v135_v30  ;;  %v143_v26 = vsub.f32 %v1380_v48, %v112_v10  ;;  %1023 = vmatprep.subr.bf16.mxu0 %v1099_v21  ;;  %v153_v40 = vpack.c.bf16 %v128_v61, %v1534_v0  ;;  %v155_v41 = vpack.c.bf16 %v130_v62, %v1537_v2 }
  0xaa   :  { %1045 = vmatprep.subr.bf16.mxu1 %v1099_v21  ;;  %793 = vst [vmem:[#allocation2 + $0xd8] sm:$0xff] %v140_v24  ;;  %800 = vst [vmem:[#allocation2 + $0x110] sm:$0x3] %v1576_v25  ;;  %v145_v49 = vsub.f32 %v1390_v50, %v112_v10  ;;  %v159_v53 = vpack.c.bf16 %v139_v9, %v134_v3  ;;  %v161_v52 = vpack.c.bf16 %v141_v17, %v136_v16  ;;  %v1101_v50 = vld [vmem:[%s1686_s1 + $0x120] sm:$0xff]  }
  0xab   :  { %797 = vst [vmem:[#allocation2 + $0xf8] sm:$0x3] %v144_v39  ;;  %799 = vst [vmem:[#allocation2 + $0x108] sm:$0x3] %v146_v36  ;;  %v137_v48 = vsub.f32 %v1375_v47, %v110_v63  ;;  %v142_v27 = vsub.f32 %v1369_v45, %v111_v33  ;;  %529 = vmatmul.mubr.bf16.gmra.mrb[4].mxu0 %v153_v40  ;;  %593 = vmatmul.mubr.bf16.gmra.mrb[4].mxu1 %v155_v41  ;;  %v1102_v45 = vld [vmem:[%s1686_s1 + $0x128] sm:$0xff]  }
  0xac   :  { %796 = vst [vmem:[#allocation2 + $0xf0] sm:$0x3] %v143_v26  ;;  %798 = vst [vmem:[#allocation2 + $0x100] sm:$0x3] %v145_v49  ;;  %1024 = vmatpush3.bf16.msra.mxu0 %v1099_v21  ;;  %1053 = vmatpush3.bf16.msra.mxu1 %v1099_v21  ;;  %v158_v28 = vpack.c.bf16 %v138_v37, %v133_v18  ;;  %v160_v32 = vpack.c.bf16 %v140_v24, %v135_v30 }
  0xad   :  { %790 = vst [vmem:[#allocation2 + $0xc0] sm:$0xff] %v137_v48  ;;  %795 = vst [vmem:[#allocation2 + $0xe8] sm:$0xff] %v142_v27  ;;  %1025 = vmatprep.subr.bf16.mxu0 %v1100_v31  ;;  %1046 = vmatprep.subr.bf16.mxu1 %v1100_v31  ;;  %v164_v47 = vpack.c.bf16 %v144_v39, %v144_v39  ;;  %v166_v34 = vpack.c.bf16 %v146_v36, %v146_v36 }
  0xae   :  { %536 = vmatprep.mubr.bf16.mxu0 %v159_v53  ;;  %600 = vmatprep.mubr.bf16.mxu1 %v161_v52  ;;  %v163_v38 = vpack.c.bf16 %v143_v26, %v143_v26  ;;  %v165_v42 = vpack.c.bf16 %v145_v49, %v145_v49  ;;  %v152_v44 = vpack.c.bf16 %v1548_v7, %v1526_v46 }
  0xaf   :  { %v162_v54 = vpack.c.bf16 %v142_v27, %v137_v48  ;;  %v157_v55 = vpack.c.bf16 %v1551_v57, %v1529_v51  ;;  %v167_v1 = vpack.c.bf16 %v1576_v25, %v1576_v25 }
  0xb0   :  { %1026 = vmatpush3.bf16.msra.mxu0 %v1100_v31  ;;  %1054 = vmatpush3.bf16.msra.mxu1 %v1100_v31 }
  0xb1   :  { %1027 = vmatprep.subr.bf16.mxu0 %v1101_v50  ;;  %1047 = vmatprep.subr.bf16.mxu1 %v1101_v50 }
  0xb3   :  { %537 = vmatmul.mubr.bf16.gmra.mrb[8].mxu0 %v158_v28  ;;  %601 = vmatmul.mubr.bf16.gmra.mrb[8].mxu1 %v160_v32 }
  0xb4   :  { %1028 = vmatpush3.bf16.msra.mxu0 %v1101_v50  ;;  %1055 = vmatpush3.bf16.msra.mxu1 %v1101_v50 }
  0xb5   :  { %1029 = vmatprep.subr.bf16.mxu0 %v1102_v45  ;;  %1048 = vmatprep.subr.bf16.mxu1 %v1102_v45 }
  0xb6   :  { %544 = vmatprep.mubr.bf16.mxu0 %v164_v47  ;;  %608 = vmatprep.mubr.bf16.mxu1 %v166_v34  ;;  %v911_v47 = vld [vmem:[%s1687_s2] ss:$0 sm:$0xff]  ;;  %s1167_s2 = smov [#allocation2]  }
  0xb8   :  { %1030 = vmatpush3.bf16.msra.mxu0 %v1102_v45  ;;  %1056 = vmatpush3.bf16.msra.mxu1 %v1102_v45 }
  0xb9   :  { %1031 = vmatprep.subr.bf16.mxu0 %v1103_v35  ;;  %1049 = vmatprep.subr.bf16.mxu1 %v1103_v35 }
  0xbb   :  { %545 = vmatmul.mubr.bf16.gmra.mrb[12].mxu0 %v163_v38  ;;  %609 = vmatmul.mubr.bf16.gmra.mrb[12].mxu1 %v165_v42 }
  0xbc   :  { %1032 = vmatpush3.bf16.msra.mxu0 %v1103_v35  ;;  %1057 = vmatpush3.bf16.msra.mxu1 %v1103_v35 }
  0xbd   :  { %1035 = vmatprep.mubr.bf16.mxu0 %v152_v44  ;;  %1039 = vmatprep.mubr.bf16.mxu1 %v162_v54  ;;  %v912_v44 = vld [vmem:[%s1688_s3] ss:$0 sm:$0xff]  ;;  %s844_s3 = sshll.u32 %s1167_s2, 4  ;;  %s845_s3 = int_to_ptr.vmem [resolvable:$true] %s844_s3 }
  0xbe   :  { %1033 = vmatprep.subr.bf16.mxu0 %v1104_v43  ;;  %1050 = vmatprep.subr.bf16.mxu1 %v1104_v43  ;;  %s1119_s17 = scalar_lea.vmem %s845_s3, 4480  ;;  %p1124_p1 = scmp.lt.s32.totalorder %s845_s3, %s845_s3 }
  0xbf   :  { %p1120_p0 = scmp.ne.s32.totalorder %s845_s3, %s1119_s17  ;;  %p1125_p2 = scmp.lt.s32.totalorder %s1119_s17, %s1119_s17 }
  0xc0   :  { %1034 = vmatpush3.bf16.msra.mxu0 %v1104_v43  ;;  %1058 = vmatpush3.bf16.msra.mxu1 %v1104_v43 }
  0xc1   :  { %p1126_p3 = por %p1125_p2, %p1124_p1 }
  0xc3   :  { %1036 = vmatmul.mubr.bf16.vlgmr.msra.gmra.mrb[16].mxu0 %v157_v55  ;;  %1040 = vmatmul.mubr.bf16.vlgmr.msra.gmra.mrb[16].mxu1 %v167_v1  ;;  %p1127_p4 = pnand %p1126_p3, %p1120_p0 }
 0x176   :  { %v943_v5 = vpop.f32.mrb[0].mxu0  ;;  %v983_v0 = vpop.f32.mrb[0].mxu1 }
 0x177   :  { %v944_v46 = vpop.f32.mrb[1].mxu0  ;;  %v984_v2 = vpop.f32.mrb[1].mxu1 }
 0x178   :  { %v945_v8 = vadd.f32 %v944_v46, %v943_v5  ;;  %v985_v22 = vadd.f32 %v984_v2, %v983_v0  ;;  %v946_v56 = vpop.f32.mrb[2].mxu0  ;;  %v986_v6 = vpop.f32.mrb[2].mxu1 }
 0x179   :  { %v947_v13 = vpop.f32.mrb[3].mxu0  ;;  %v987_v4 = vpop.f32.mrb[3].mxu1 }
 0x17a   :  { %v948_v7 = vadd.f32 %v947_v13, %v946_v56  ;;  %v988_v12 = vadd.f32 %v987_v4, %v986_v6  ;;  %v587_v15 = vadd.f32 %v985_v22, %v945_v8 }
 0x17c   :  { %v590_v11 = vadd.f32 %v988_v12, %v948_v7 }
 0x17e   :  { %v949_v51 = vpop.f32.mrb[4].mxu0  ;;  %v989_v57 = vpop.f32.mrb[4].mxu1 }
 0x17f   :  { %v950_v58 = vpop.f32.mrb[5].mxu0  ;;  %v990_v14 = vpop.f32.mrb[5].mxu1 }
 0x180   :  { %v951_v59 = vadd.f32 %v950_v58, %v949_v51  ;;  %v991_v60 = vadd.f32 %v990_v14, %v989_v57  ;;  %v952_v61 = vpop.f32.mrb[6].mxu0  ;;  %v992_v23 = vpop.f32.mrb[6].mxu1 }
 0x181   :  { %v953_v33 = vpop.f32.mrb[7].mxu0  ;;  %v993_v62 = vpop.f32.mrb[7].mxu1 }
 0x182   :  { %v954_v63 = vadd.f32 %v953_v33, %v952_v61  ;;  %v994_v20 = vadd.f32 %v993_v62, %v992_v23  ;;  %v595_v29 = vadd.f32 %v991_v60, %v951_v59 }
 0x184   :  { %v598_v19 = vadd.f32 %v994_v20, %v954_v63 }
 0x186   :  { %v955_v3 = vpop.f32.mrb[8].mxu0  ;;  %v995_v9 = vpop.f32.mrb[8].mxu1 }
 0x187   :  { %v956_v10 = vpop.f32.mrb[9].mxu0  ;;  %v996_v21 = vpop.f32.mrb[9].mxu1 }
 0x188   :  { %v957_v16 = vadd.f32 %v956_v10, %v955_v3  ;;  %v997_v17 = vadd.f32 %v996_v21, %v995_v9  ;;  %v958_v18 = vpop.f32.mrb[10].mxu0  ;;  %v998_v37 = vpop.f32.mrb[10].mxu1 }
 0x189   :  { %v959_v30 = vpop.f32.mrb[11].mxu0  ;;  %v999_v24 = vpop.f32.mrb[11].mxu1 }
 0x18a   :  { %v960_v25 = vadd.f32 %v959_v30, %v958_v18  ;;  %v1000_v39 = vadd.f32 %v999_v24, %v998_v37  ;;  %v603_v36 = vadd.f32 %v997_v17, %v957_v16 }
 0x18c   :  { %v606_v26 = vadd.f32 %v1000_v39, %v960_v25 }
 0x18e   :  { %v961_v40 = vpop.f32.mrb[12].mxu0  ;;  %v1001_v41 = vpop.f32.mrb[12].mxu1 }
 0x18f   :  { %v962_v31 = vpop.f32.mrb[13].mxu0  ;;  %v1002_v49 = vpop.f32.mrb[13].mxu1 }
 0x190   :  { %v963_v53 = vadd.f32 %v962_v31, %v961_v40  ;;  %v1003_v52 = vadd.f32 %v1002_v49, %v1001_v41  ;;  %v964_v48 = vpop.f32.mrb[14].mxu0  ;;  %v1004_v27 = vpop.f32.mrb[14].mxu1 }
 0x191   :  { %v965_v50 = vpop.f32.mrb[15].mxu0  ;;  %v1005_v28 = vpop.f32.mrb[15].mxu1 }
 0x192   :  { %v611_v32 = vadd.f32 %v1003_v52, %v963_v53 }
 0x196   :  { %v1037_v45 = vpop.f32.mrb[16].mxu0  ;;  %v1041_v34 = vpop.f32.mrb[16].mxu1 }
 0x197   :  { %v659_v35 = vadd.f32 %v1037_v45, %v595_v29  ;;  %v675_v38 = vadd.f32 %v1041_v34, %v611_v32  ;;  %v650_v42 = vpop.f32.mrb[17].mxu0  ;;  %v666_v43 = vpop.f32.mrb[17].mxu1 }
 0x198   :  { %v651_v54 = vadd.f32 %v650_v42, %v587_v15  ;;  %v667_v55 = vadd.f32 %v666_v43, %v603_v36  ;;  %v1038_v1 = vpop.f32.mrb[18].mxu0  ;;  %v1042_v5 = vpop.f32.mrb[18].mxu1 }
 0x199   :  { %v689_v0 = vmul.f32 %v911_v47, %v659_v35  ;;  %v662_v46 = vadd.f32 %v1038_v1, %v598_v19  ;;  %v653_v2 = vpop.f32.mrb[19].mxu0  ;;  %v669_v8 = vpop.f32.mrb[19].mxu1  ;;  %v693_v12 = vmul.f32 %v911_v47, %v675_v38 }
 0x19a   :  { %v687_v22 = vmul.f32 %v911_v47, %v651_v54  ;;  %v691_v56 = vmul.f32 %v911_v47, %v667_v55  ;;  %v654_v6 = vadd.f32 %v653_v2, %v590_v11  ;;  %v670_v13 = vadd.f32 %v669_v8, %v606_v26 }
 0x19b   :  { %v703_v4 = vadd.f32 %v912_v44, %v689_v0  ;;  %v690_v7 = vmul.f32 %v911_v47, %v662_v46  ;;  %v707_v62 = vadd.f32 %v912_v44, %v693_v12 }
 0x19c   :  { %v701_v51 = vadd.f32 %v912_v44, %v687_v22  ;;  %v688_v57 = vmul.f32 %v911_v47, %v654_v6  ;;  %v692_v58 = vmul.f32 %v911_v47, %v670_v13  ;;  %v705_v14 = vadd.f32 %v912_v44, %v691_v56 }
 0x19d   :  { %v704_v59 = vadd.f32 %v912_v44, %v690_v7  ;;  %v1614_v15 = vmax.f32 %v703_v4, 0.0  ;;  %v1639_v18 = vmax.f32 %v707_v62, 0.0 }
 0x19e   :  { %v702_v60 = vadd.f32 %v912_v44, %v688_v57  ;;  %v1616_v61 = vmax.f32 %v701_v51, 0.0  ;;  %v706_v23 = vadd.f32 %v912_v44, %v692_v58  ;;  %v1629_v3 = vmax.f32 %v705_v14, 0.0 }
 0x19f   :  { %v717_v33 = vmul.f32 %v1614_v15, %v1614_v15  ;;  %v1620_v11 = vmax.f32 %v704_v59, 0.0  ;;  %v721_v25 = vmul.f32 %v1639_v18, %v1639_v18 }
 0x1a0   :  { %v1622_v63 = vmax.f32 %v702_v60, 0.0  ;;  %v715_v19 = vmul.f32 %v1616_v61, %v1616_v61  ;;  %v1634_v21 = vmax.f32 %v706_v23, 0.0  ;;  %v719_v17 = vmul.f32 %v1629_v3, %v1629_v3 }
 0x1a1   :  { %v729_v20 = vsel %vm722_vm1, %v717_v33, 0.0  ;;  %v718_v29 = vmul.f32 %v1620_v11, %v1620_v11  ;;  %v742_v36 = vsel %vm741_vm2, %v721_v25, 0.0 }
 0x1a2   :  { %730 = vadd.xlane.f32.xlu1 %v729_v20  ;;  %v716_v10 = vmul.f32 %v1622_v63, %v1622_v63  ;;  %v723_v16 = vsel %vm722_vm1, %v715_v19, 0.0  ;;  %v720_v30 = vmul.f32 %v1634_v21, %v1634_v21  ;;  %v735_v24 = vsel %vm722_vm1, %v719_v17, 0.0 }
 0x1a3   :  { %v732_v9 = vsel %vm722_vm1, %v718_v29, 0.0 }
 0x1a4   :  { %733 = vadd.xlane.f32.xlu0 %v732_v9  ;;  %v726_v37 = vsel %vm722_vm1, %v716_v10, 0.0  ;;  %v738_v39 = vsel %vm722_vm1, %v720_v30, 0.0 }
 0x1a6   :  { %724 = vadd.xlane.f32.xlu1 %v723_v16 }
 0x1a8   :  { %727 = vadd.xlane.f32.xlu0 %v726_v37 }
 0x1aa   :  { %736 = vadd.xlane.f32.xlu1 %v735_v24 }
 0x1ac   :  { %739 = vadd.xlane.f32.xlu0 %v738_v39 }
 0x1ae   :  { %743 = vadd.xlane.f32.xlu1 %v742_v36 }
 0x1af   :  { %1130 = shalt.err (!%p1127_p4)
}
 0x1b0   :  { %s1131_s20 = scalar_lea.hbm %s1689_s4, 4480 }
 0x1b1   :  { %p1132_p5 = scmp.ne.s32.totalorder %s1689_s4, %s1131_s20  ;;  %p1135_p6 = scmp.lt.u32.totalorder %s1131_s20, %s1689_s4 }
 0x1b3   :  { %p1137_p7 = pnand %p1135_p6, %p1132_p5 }
 0x1b5   :  { %1140 = shalt.err (!%p1137_p7)
}
 0x1b6   :  { %s1168_s25 = smov 640   ;;  %s1169_s26 = smov 40   ;;  %vm830_vm3 = vcmask 519168   ;;  %vm837_vm4 = vcmask 516096  }
 0x1b7   :  { %850 = dma.vmem_to_hbm [thread:$0]  %s845_s3, 4480, %s1689_s4, [#allocation3], %s1168_s25, %s1168_s25, %s1169_s26  }
 0x1b8   :  { %s1170_s4 = smov [#allocation4]  }
 0x1b9   :  { %s856_s29 = sshll.u32 %s1170_s4, 4  ;;  %s857_s29 = int_to_ptr.vmem [resolvable:$true] %s856_s29 }
 0x1ba   :  { %s1141_s30 = scalar_lea.vmem %s857_s29, 448  ;;  %p1146_p9 = scmp.lt.s32.totalorder %s857_s29, %s857_s29 }
 0x1bb   :  { %p1142_p8 = scmp.ne.s32.totalorder %s857_s29, %s1141_s30  ;;  %p1147_p10 = scmp.lt.s32.totalorder %s1141_s30, %s1141_s30 }
 0x1bd   :  { %p1148_p11 = por %p1147_p10, %p1146_p9 }
 0x1bf   :  { %p1149_p12 = pnand %p1148_p11, %p1142_p8 }
 0x22f   :  { %v731_v26 = vpop.xlane.xlu1 %730 }
 0x230   :  { %v747_v40 = vmax.f32 %v731_v26, 1e-16 }
 0x231   :  { %v734_v41 = vpop.xlane.xlu0 %733 }
 0x232   :  { %1105 = vrsqrt.f32 %v747_v40  ;;  %v748_v31 = vmax.f32 %v734_v41, 1e-16 }
 0x233   :  { %v725_v49 = vpop.xlane.xlu1 %724 }
 0x234   :  { %1107 = vrsqrt.f32 %v748_v31  ;;  %v745_v53 = vmax.f32 %v725_v49, 1e-16 }
 0x235   :  { %v728_v52 = vpop.xlane.xlu0 %727 }
 0x236   :  { %1109 = vrsqrt.f32 %v745_v53  ;;  %v746_v48 = vmax.f32 %v728_v52, 1e-16 }
 0x237   :  { %v737_v27 = vpop.xlane.xlu1 %736 }
 0x238   :  { %1111 = vrsqrt.f32 %v746_v48  ;;  %v749_v50 = vmax.f32 %v737_v27, 1e-16 }
 0x239   :  { %v740_v28 = vpop.xlane.xlu0 %739 }
 0x23a   :  { %1113 = vrsqrt.f32 %v749_v50  ;;  %v750_v32 = vmax.f32 %v740_v28, 1e-16 }
 0x23b   :  { %v744_v45 = vpop.xlane.xlu1 %743 }
 0x23c   :  { %v1106_v47 = vpop.eup %1105  ;;  %1115 = vrsqrt.f32 %v750_v32  ;;  %v751_v34 = vmax.f32 %v744_v45, 1e-16 }
 0x23d   :  { %v761_v35 = vmul.f32 %v1106_v47, %v1614_v15 }
 0x23e   :  { %v1108_v38 = vpop.eup %1107  ;;  %1117 = vrsqrt.f32 %v751_v34 }
 0x23f   :  { %v922_v42 = vpack.c.bf16 %v761_v35, %v761_v35  ;;  %v762_v43 = vmul.f32 %v1108_v38, %v1620_v11 }
 0x240   :  { %v1110_v44 = vpop.eup %1109 }
 0x241   :  { %833 = vst.msk [vmem:[#allocation4 + $0x8] sm:$0xf] %vm830_vm3, %v922_v42  ;;  %v923_v54 = vpack.c.bf16 %v762_v43, %v762_v43  ;;  %v759_v55 = vmul.f32 %v1110_v44, %v1616_v61 }
 0x242   :  { %v1112_v1 = vpop.eup %1111 }
 0x243   :  { %834 = vst.msk [vmem:[#allocation4 + $0xc] sm:$0xf] %vm830_vm3, %v923_v54  ;;  %v920_v5 = vpack.c.bf16 %v759_v55, %v759_v55  ;;  %v760_v0 = vmul.f32 %v1112_v1, %v1622_v63 }
 0x244   :  { %v1114_v46 = vpop.eup %1113 }
 0x245   :  { %831 = vst.msk [vmem:[#allocation4] sm:$0xf] %vm830_vm3, %v920_v5  ;;  %v921_v2 = vpack.c.bf16 %v760_v0, %v760_v0  ;;  %v763_v8 = vmul.f32 %v1114_v46, %v1629_v3 }
 0x246   :  { %v1116_v22 = vpop.eup %1115 }
 0x247   :  { %832 = vst.msk [vmem:[#allocation4 + $0x4] sm:$0xf] %vm830_vm3, %v921_v2  ;;  %v924_v56 = vpack.c.bf16 %v763_v8, %v763_v8  ;;  %v764_v6 = vmul.f32 %v1116_v22, %v1634_v21 }
 0x248   :  { %v1118_v13 = vpop.eup %1117 }
 0x249   :  { %835 = vst.msk [vmem:[#allocation4 + $0x10] sm:$0xf] %vm830_vm3, %v924_v56  ;;  %v925_v4 = vpack.c.bf16 %v764_v6, %v764_v6  ;;  %v765_v7 = vmul.f32 %v1118_v13, %v1639_v18 }
 0x24b   :  { %836 = vst.msk [vmem:[#allocation4 + $0x14] sm:$0xf] %vm830_vm3, %v925_v4  ;;  %v926_v12 = vpack.c.bf16 %v765_v7, %v765_v7 }
 0x24d   :  { %838 = vst.msk [vmem:[#allocation4 + $0x18] sm:$0x1] %vm837_vm4, %v926_v12 }
 0x24e   :  { %1152 = shalt.err (!%p1149_p12)
}
 0x24f   :  { %s1153_s8 = scalar_lea.hbm %s1690_s5, 448 }
 0x250   :  { %p1154_p13 = scmp.ne.s32.totalorder %s1690_s5, %s1153_s8  ;;  %p1157_p0 = scmp.lt.u32.totalorder %s1153_s8, %s1690_s5 }
 0x252   :  { %p1159_p1 = pnand %p1157_p0, %p1154_p13 }
 0x254   :  { %1162 = shalt.err (!%p1159_p1)
}
 0x255   :  { %s1171_s13 = smov 64   ;;  %s1172_s14 = smov 4  }
 0x256   :  { %862 = dma.vmem_to_hbm [thread:$0]  %s857_s29, 448, %s1690_s5, [#allocation5], %s1171_s13, %s1171_s13, %s1172_s14  }
 0x257   :  { %1163 = dma.done.wait [#allocation3], 4480  }
 0x258   :  { %1164 = vsyncadd [#allocation3], 4294962816 }
 0x259   :  { %1165 = dma.done.wait [#allocation5], 448  }
 0x25a   :  { %1166 = vsyncadd [#allocation5], 4294966848 }
 0x25b   :  { %869 = vsyncpa [#allocation3], 1 }
 0x25c   :  { %870 = vsyncpa [#allocation5], 1 }

</bundles_post_ra>
